<compile_context>
chip_gen: v7x
topology: tpu7x:2x2x1
jax: 0.10.0
libtpu: 0.0.40
codegen_flags: <defaults>
</compile_context>

<pallas_src>
import functools

import jax
import jax.numpy as jnp
from jax.experimental import pallas as pl
from jax.experimental.pallas import tpu as pltpu


def _round_up(x: int, m: int) -> int:
    return ((x + m - 1) // m) * m


def _choose_grid(B: int, max_tile: int = 2048, split_threshold: int = 1024):
    """Pick (TB, n_steps) from B.

    * small B: a single grid step (grid=1 is optimal on the 1-TC v5e/v6e and fine
      on v7x at these sizes).
    * large B: an even number of steps (>= 2) so v7x's two TensorCores both get
      work via the "parallel" batch axis, with per-tile rows capped at max_tile.
    Padding is bounded to < 8 * n_steps rows.
    """
    if B <= split_threshold:
        n_steps = 1
    else:
        n_steps = max(2, -(-B // max_tile))
        n_steps += n_steps % 2  # even -> shards evenly across 2 TCs on v7x
    TB = _round_up(-(-B // n_steps), 8)  # sublane-aligned
    return TB, n_steps


def mlp_critic_kernel(x_ref, w1_ref, b1_ref, w2_ref, b2_ref, w3_ref, b3_ref,
                      o_ref, *, compute_dtype):
    """One batch tile of the critic MLP, entirely in VMEM.

    x_ref : (TB, obs_dim)              (f32 or bf16)
    w1    : (obs_dim, h1p), b1: (1, h1p) f32
    w2    : (h1p, h2p),     b2: (1, h2p) f32
    w3    : (1, h2p) f32   (final layer stored as a row)
    b3    : (1,) f32 in SMEM (scalar)
    o_ref : (1, 1, TB) f32  (lane-dense output row)
    """
    x = x_ref[...].astype(compute_dtype)

    # layer 1: Linear + Tanh (MXU matmul, f32 accumulate; bias/tanh f32 on VPU/EUP)
    h1 = jnp.dot(x, w1_ref[...], preferred_element_type=jnp.float32)
    h1 = jnp.tanh(h1 + b1_ref[...])

    # layer 2: Linear + Tanh
    h2 = jnp.dot(h1.astype(compute_dtype), w2_ref[...],
                 preferred_element_type=jnp.float32)
    h2 = jnp.tanh(h2 + b2_ref[...])

    # output layer (width 1): VPU multiply + XLU lane-reduce instead of a 1-column
    # MXU matmul. Padded lanes of h2 / w3 are exactly zero, so they contribute 0.
    v = jnp.sum(h2 * w3_ref[...], axis=-1) + b3_ref[0]        # (TB,)
    # Relayout to a lane-dense row (cheap XLU work; avoids masked column stores).
    o_ref[...] = v.reshape(o_ref.shape).astype(o_ref.dtype)


def prepare_params(raw_params, lane: int = 128, use_bf16: bool = False):
    """Repack nn.Linear-style params ((in,out) weights, (1,out) biases) for the kernel.

    Hidden widths are zero-padded to a multiple of `lane` (lane-dense vregs; padding
    is semantics-preserving). The final (h2, 1) weight is stored as a (1, h2p) row so
    the output layer runs as a VPU mul + lane reduce, and b3 is a (1,) SMEM scalar.
    With use_bf16=True the two MXU weight matrices are pre-cast to bf16 ONCE here
    (halves weight DMA bytes, no per-step VPU casts); biases / w3 stay f32.
    """
    w1, b1, w2, b2, w3, b3 = raw_params
    obs_dim, h1 = w1.shape
    h2 = w2.shape[1]
    h1p = _round_up(h1, lane)
    h2p = _round_up(h2, lane)
    wdt = jnp.bfloat16 if use_bf16 else jnp.float32

    w1p = jnp.zeros((obs_dim, h1p), jnp.float32).at[:, :h1].set(w1).astype(wdt)
    b1p = jnp.zeros((1, h1p), jnp.float32).at[:, :h1].set(b1)
    w2p = jnp.zeros((h1p, h2p), jnp.float32).at[:h1, :h2].set(w2).astype(wdt)
    b2p = jnp.zeros((1, h2p), jnp.float32).at[:, :h2].set(b2)
    w3p = jnp.zeros((1, h2p), jnp.float32).at[:, :h2].set(w3.reshape(1, h2))
    b3p = jnp.reshape(b3, (1,)).astype(jnp.float32)
    return (w1p, b1p, w2p, b2p, w3p, b3p)


def mlp_critic_forward(obs, params, *, max_tile: int = 2048,
                       split_threshold: int = 1024):
    """Pallas forward. `params` must come from prepare_params. Returns (B,) float32.

    Compute dtype follows the weight dtype (bf16 MXU operands are fine on
    v5e/v6e/v7x; accumulation and elementwise math are always f32). For the bf16
    path, feeding `obs` already in bf16 halves the dominant HBM stream.
    """
    w1, b1, w2, b2, w3, b3 = params
    B, obs_dim = obs.shape
    h1p = w1.shape[1]
    h2p = w2.shape[1]
    compute_dtype = w1.dtype

    TB, n_steps = _choose_grid(B, max_tile, split_threshold)
    B_pad = TB * n_steps
    if B_pad != B:
        obs = jnp.pad(obs, ((0, B_pad - B), (0, 0)))

    flops = int(2 * B_pad * (obs_dim * h1p + h1p * h2p + h2p))
    transcendentals = int(B_pad * (h1p + h2p))
    bytes_accessed = int(
        B_pad * obs_dim * obs.dtype.itemsize
        + B_pad * 4
        + sum(int(p.size) * p.dtype.itemsize for p in params)
    )

    kernel = functools.partial(mlp_critic_kernel, compute_dtype=compute_dtype)

    out = pl.pallas_call(
        kernel,
        out_shape=jax.ShapeDtypeStruct((n_steps, 1, TB), jnp.float32),
        grid_spec=pltpu.PrefetchScalarGridSpec(
            num_scalar_prefetch=0,
            grid=(n_steps,),
            in_specs=[
                # obs: tiled along the batch; pipelined (double-buffered) across steps.
                pl.BlockSpec((TB, obs_dim), lambda i: (i, 0)),
                # weights / biases: constant block index -> fetched once, VMEM-resident.
                pl.BlockSpec(w1.shape, lambda i: (0, 0)),
                pl.BlockSpec(b1.shape, lambda i: (0, 0)),
                pl.BlockSpec(w2.shape, lambda i: (0, 0)),
                pl.BlockSpec(b2.shape, lambda i: (0, 0)),
                pl.BlockSpec(w3.shape, lambda i: (0, 0)),
                # b3: single scalar, lives in SMEM.
                pl.BlockSpec(memory_space=pltpu.MemorySpace.SMEM),
            ],
            # Lane-dense output: one contiguous TB-wide row per grid step.
            out_specs=pl.BlockSpec((1, 1, TB), lambda i: (i, 0, 0)),
        ),
        compiler_params=pltpu.CompilerParams(
            # Batch axis is embarrassingly parallel -> megacore / v7x 2-TC sharding.
            dimension_semantics=("parallel",),
        ),
        cost_estimate=pl.CostEstimate(
            flops=flops,
            transcendentals=transcendentals,
            bytes_accessed=bytes_accessed,
        ),
    )(obs, w1, b1, w2, b2, w3, b3)

    # (n_steps, 1, TB) -> (B,): drop batch padding + torch.squeeze(..., -1)
    return out.reshape(-1)[:B]


def init_params(key, obs_dim, hidden_sizes):
    """nn.Linear-like init (U[-1/sqrt(fan_in), 1/sqrt(fan_in)]); weights stored (in, out)."""
    sizes = [obs_dim] + list(hidden_sizes) + [1]
    params = []
    for j in range(len(sizes) - 1):
        fan_in, fan_out = sizes[j], sizes[j + 1]
        key, kw, kb = jax.random.split(key, 3)
        bound = 1.0 / jnp.sqrt(jnp.float32(fan_in))
        w = jax.random.uniform(kw, (fan_in, fan_out), jnp.float32, -bound, bound)
        b = jax.random.uniform(kb, (1, fan_out), jnp.float32, -bound, bound)
        params += [w, b]
    return tuple(params)


def mlp_critic_reference(obs, raw_params):
    """Pure-JAX reference of the same forward (Tanh hidden, Identity output)."""
    w1, b1, w2, b2, w3, b3 = raw_params
    h = jnp.tanh(obs @ w1 + b1)
    h = jnp.tanh(h @ w2 + b2)
    v = h @ w3 + b3
    return jnp.squeeze(v, axis=-1)


if __name__ == "__main__":
    key = jax.random.PRNGKey(0)

    # MLPCritic-consistent shapes: batch of flat observations.
    batch = 8
    obs_dim = 16
    hidden_sizes = (32, 32)

    key, k_obs, k_par = jax.random.split(key, 3)
    obs = jax.random.normal(k_obs, (batch, obs_dim), dtype=jnp.float32)
    raw_params = init_params(k_par, obs_dim, hidden_sizes)
    v_ref = mlp_critic_reference(obs, raw_params)

    fwd = jax.jit(mlp_critic_forward)

    # f32 path (tight tolerance).
    params_f32 = prepare_params(raw_params, use_bf16=False)
    v = jax.block_until_ready(fwd(obs, params_f32))
    assert v.shape == (batch,), v.shape
    assert jnp.allclose(v, v_ref, atol=1e-5, rtol=1e-5), (v, v_ref)

    # bf16-MXU-operand path (valid on v5e/v6e/v7x): weights pre-cast once outside the
    # kernel, obs fed as bf16 so the dominant HBM stream is halved; f32 accumulate/tanh.
    params_bf16 = prepare_params(raw_params, use_bf16=True)
    v_bf16 = jax.block_until_ready(fwd(obs.astype(jnp.bfloat16), params_bf16))
    assert v_bf16.shape == (batch,), v_bf16.shape
    assert jnp.allclose(v_bf16, v_ref, atol=3e-2, rtol=3e-2), (v_bf16, v_ref)

    # Larger batch: exercises the 2-step batch grid (TB=1000, grid=(2,), v7x 2-TC
    # sharding), lane-dense (1,1,TB) output blocks, and bounded batch padding.
    key, k_big = jax.random.split(key)
    obs_big = jax.random.normal(k_big, (2000, obs_dim), dtype=jnp.float32)
    v_big = jax.block_until_ready(fwd(obs_big, params_f32))
    v_big_ref = mlp_critic_reference(obs_big, raw_params)
    assert v_big.shape == (2000,), v_big.shape
    assert jnp.allclose(v_big, v_big_ref, atol=1e-5, rtol=1e-5)

    print("KERNEL_OK")
</pallas_src>

<mosaic_0001>
module attributes {stable_mosaic.version = 11 : i64} {
  func.func @mlp_critic_kernel(%arg0: i32, %arg1: memref<8x16xf32, #tpu.memory_space<vmem>>, %arg2: memref<16x128xf32, #tpu.memory_space<vmem>>, %arg3: memref<1x128xf32, #tpu.memory_space<vmem>>, %arg4: memref<128x128xf32, #tpu.memory_space<vmem>>, %arg5: memref<1x128xf32, #tpu.memory_space<vmem>>, %arg6: memref<1x128xf32, #tpu.memory_space<vmem>>, %arg7: memref<1xf32, #tpu.memory_space<smem>>, %arg8: memref<1x1x8xf32, #tpu.memory_space<vmem>>) attributes {dimension_semantics = [#tpu.dimension_semantics<parallel>], iteration_bounds = array<i64: 1>, scalar_prefetch = 0 : i64, scratch_operands = 0 : i64, tpu.core_type = #tpu.core_type<tc>, window_params = [{transform_indices = @transform_0, window_bounds = array<i64: 8, 16>}, {pipeline_mode = #tpu.pipeline_mode<synchronous>, transform_indices = @transform_1, window_bounds = array<i64: 16, 128>}, {pipeline_mode = #tpu.pipeline_mode<synchronous>, transform_indices = @transform_2, window_bounds = array<i64: 1, 128>}, {pipeline_mode = #tpu.pipeline_mode<synchronous>, transform_indices = @transform_3, window_bounds = array<i64: 128, 128>}, {pipeline_mode = #tpu.pipeline_mode<synchronous>, transform_indices = @transform_4, window_bounds = array<i64: 1, 128>}, {pipeline_mode = #tpu.pipeline_mode<synchronous>, transform_indices = @transform_5, window_bounds = array<i64: 1, 128>}, {transform_indices = @transform_6, window_bounds = array<i64: 1>}, {transform_indices = @transform_7, window_bounds = array<i64: 1, 1, 8>}]} {
    %c0 = arith.constant 0 : index
    %c0_0 = arith.constant 0 : index
    %0 = vector.load %arg1[%c0, %c0_0] : memref<8x16xf32, #tpu.memory_space<vmem>>, vector<8x16xf32>
    %c0_1 = arith.constant 0 : index
    %c0_2 = arith.constant 0 : index
    %1 = vector.load %arg2[%c0_1, %c0_2] : memref<16x128xf32, #tpu.memory_space<vmem>>, vector<16x128xf32>
    %cst = arith.constant dense<0.000000e+00> : vector<8x128xf32>
    %2 = tpu.matmul %0, %1, %cst {dimension_numbers = #tpu.dot_dimension_numbers<[1], [0], [0], [1], [0, 0, 1, 1], [], []>} : vector<8x16xf32>, vector<16x128xf32>, vector<8x128xf32> -> vector<8x128xf32>
    %c0_3 = arith.constant 0 : index
    %c0_4 = arith.constant 0 : index
    %3 = vector.load %arg3[%c0_3, %c0_4] : memref<1x128xf32, #tpu.memory_space<vmem>>, vector<1x128xf32>
    %4 = vector.broadcast %3 : vector<1x128xf32> to vector<8x128xf32>
    %5 = arith.addf %2, %4 : vector<8x128xf32>
    %6 = math.tanh %5 : vector<8x128xf32>
    %c0_5 = arith.constant 0 : index
    %c0_6 = arith.constant 0 : index
    %7 = vector.load %arg4[%c0_5, %c0_6] : memref<128x128xf32, #tpu.memory_space<vmem>>, vector<128x128xf32>
    %cst_7 = arith.constant dense<0.000000e+00> : vector<8x128xf32>
    %8 = tpu.matmul %6, %7, %cst_7 {dimension_numbers = #tpu.dot_dimension_numbers<[1], [0], [0], [1], [0, 0, 1, 1], [], []>} : vector<8x128xf32>, vector<128x128xf32>, vector<8x128xf32> -> vector<8x128xf32>
    %c0_8 = arith.constant 0 : index
    %c0_9 = arith.constant 0 : index
    %9 = vector.load %arg5[%c0_8, %c0_9] : memref<1x128xf32, #tpu.memory_space<vmem>>, vector<1x128xf32>
    %10 = vector.broadcast %9 : vector<1x128xf32> to vector<8x128xf32>
    %11 = arith.addf %8, %10 : vector<8x128xf32>
    %12 = math.tanh %11 : vector<8x128xf32>
    %c0_10 = arith.constant 0 : index
    %c0_11 = arith.constant 0 : index
    %13 = vector.load %arg6[%c0_10, %c0_11] : memref<1x128xf32, #tpu.memory_space<vmem>>, vector<1x128xf32>
    %14 = vector.broadcast %13 : vector<1x128xf32> to vector<8x128xf32>
    %15 = arith.mulf %12, %14 : vector<8x128xf32>
    %cst_12 = arith.constant dense<0.000000e+00> : vector<8xf32>
    %16 = vector.multi_reduction <add>, %15, %cst_12 [1] : vector<8x128xf32> to vector<8xf32>
    %c0_13 = arith.constant 0 : index
    %17 = memref.load %arg7[%c0_13] : memref<1xf32, #tpu.memory_space<smem>>
    %18 = vector.broadcast %17 : f32 to vector<8xf32>
    %19 = arith.addf %16, %18 : vector<8xf32>
    %20 = vector.shape_cast %19 : vector<8xf32> to vector<1x1x8xf32>
    %c0_14 = arith.constant 0 : index
    %c0_15 = arith.constant 0 : index
    %c0_16 = arith.constant 0 : index
    %21 = vector.load %arg8[%c0_14, %c0_15, %c0_16] : memref<1x1x8xf32, #tpu.memory_space<vmem>>, vector<1x1x8xf32>
    tpu.vector_store %arg8[%c0_14, %c0_15, %c0_16], %20 {strides = array<i32>} : memref<1x1x8xf32, #tpu.memory_space<vmem>>, vector<1x1x8xf32>,
    return
  }
  func.func @transform_0(%arg0: i32) -> (i32, i32) {
    %c0_i32 = arith.constant 0 : i32
    %c0_i32_0 = arith.constant 0 : i32
    return %arg0, %c0_i32 : i32, i32
  }
  func.func @transform_1(%arg0: i32) -> (i32, i32) {
    %c0_i32 = arith.constant 0 : i32
    %c0_i32_0 = arith.constant 0 : i32
    %c0_i32_1 = arith.constant 0 : i32
    return %c0_i32, %c0_i32_0 : i32, i32
  }
  func.func @transform_2(%arg0: i32) -> (i32, i32) {
    %c0_i32 = arith.constant 0 : i32
    %c0_i32_0 = arith.constant 0 : i32
    %c0_i32_1 = arith.constant 0 : i32
    return %c0_i32, %c0_i32_0 : i32, i32
  }
  func.func @transform_3(%arg0: i32) -> (i32, i32) {
    %c0_i32 = arith.constant 0 : i32
    %c0_i32_0 = arith.constant 0 : i32
    %c0_i32_1 = arith.constant 0 : i32
    return %c0_i32, %c0_i32_0 : i32, i32
  }
  func.func @transform_4(%arg0: i32) -> (i32, i32) {
    %c0_i32 = arith.constant 0 : i32
    %c0_i32_0 = arith.constant 0 : i32
    %c0_i32_1 = arith.constant 0 : i32
    return %c0_i32, %c0_i32_0 : i32, i32
  }
  func.func @transform_5(%arg0: i32) -> (i32, i32) {
    %c0_i32 = arith.constant 0 : i32
    %c0_i32_0 = arith.constant 0 : i32
    %c0_i32_1 = arith.constant 0 : i32
    return %c0_i32, %c0_i32_0 : i32, i32
  }
  func.func @transform_6(%arg0: i32) -> i32 {
    %c0_i32 = arith.constant 0 : i32
    %c0_i32_0 = arith.constant 0 : i32
    return %c0_i32 : i32
  }
  func.func @transform_7(%arg0: i32) -> (i32, i32, i32) {
    %c0_i32 = arith.constant 0 : i32
    %c0_i32_0 = arith.constant 0 : i32
    %c0_i32_1 = arith.constant 0 : i32
    return %arg0, %c0_i32, %c0_i32_0 : i32, i32, i32
  }
}

</mosaic_0001>

<bundles_post_ra>
// kernel: mlp_critic_forward.1
= control target key start
LH: loop header
LB: loop body
LE: loop exit
PB: predicated region body
PF: predicated region fallthrough
CT: control target
= control target key end

     0   :  { %13 = vsyncpa [#allocation4], 0  ;;  %s600_s0 = inlined_call_operand.hbm [shape: f32[8,16], index: 0, kind: input, shape index: {}]   ;;  %s601_s1 = inlined_call_operand.hbm [shape: f32[16,128], index: 1, kind: input, shape index: {}]   ;;  %s602_s2 = inlined_call_operand.vmem [shape: f32[1,128], index: 2, kind: input, shape index: {}]   ;;  %s603_s3 = inlined_call_operand.hbm [shape: f32[128,128], index: 3, kind: input, shape index: {}]   ;;  %s604_s4 = inlined_call_operand.vmem [shape: f32[1,128], index: 4, kind: input, shape index: {}]   ;;  %s605_s5 = inlined_call_operand.vmem [shape: f32[1,128], index: 5, kind: input, shape index: {}]   ;;  %s606_s6 = inlined_call_operand.<no memory space> [shape: f32[1], index: 6, kind: input, shape index: {}]   ;;  %s607_s7 = inlined_call_operand.hbm [shape: f32[1,1,8], index: 7, kind: output, shape index: {}]  }
   0x1   :  { %14 = vsyncpa [#allocation7], 0 }
   0x2   :  { %15 = vsyncpa [#allocation5], 0  ;;  %s485_s24 = smov [#allocation6]   ;;  %s391_s28 = scalar_lea.hbm %s601_s1, 256 }
   0x3   :  { %s31_s25 = sshll.u32 %s485_s24, 4  ;;  %p392_p0 = scmp.ne.s32.totalorder %s601_s1, %s391_s28  ;;  %s32_s25 = int_to_ptr.vmem [resolvable:$true] %s31_s25 }
   0x4   :  { %p395_p1 = scmp.lt.u32.totalorder %s391_s28, %s601_s1 }
   0x6   :  { %p397_p2 = pnand %p395_p1, %p392_p0 }
   0x8   :  { %400 = shalt.err (!%p397_p2)
}
   0x9   :  { %s401_s10 = scalar_lea.vmem %s32_s25, 256  ;;  %p406_p4 = scmp.lt.s32.totalorder %s32_s25, %s32_s25 }
   0xa   :  { %p402_p3 = scmp.ne.s32.totalorder %s32_s25, %s401_s10  ;;  %p407_p5 = scmp.lt.s32.totalorder %s401_s10, %s401_s10 }
   0xc   :  { %p408_p6 = por %p407_p5, %p406_p4 }
   0xe   :  { %p409_p7 = pnand %p408_p6, %p402_p3 }
  0x10   :  { %412 = shalt.err (!%p409_p7)
}
  0x11   :  { %s486_s11 = smov 128   ;;  %s487_s12 = smov 8  }
  0x12   :  { %37 = dma.hbm_to_vmem [thread:$0]  %s601_s1, 256, %s32_s25, [#allocation7], %s486_s11, %s486_s11, %s487_s12  }
  0x13   :  { %s488_s15 = smov [#allocation3]   ;;  %s489_s17 = smov [#allocation8]  }
  0x14   :  { %s22_s16 = sshll.u32 %s488_s15, 4  ;;  %s45_s18 = sshll.u32 %s489_s17, 4  ;;  %s23_s16 = int_to_ptr.vmem [resolvable:$true] %s22_s16  ;;  %s46_s18 = int_to_ptr.vmem [resolvable:$true] %s45_s18 }
  0x15   :  { %s413_s21 = scalar_lea.hbm %s600_s0, 128 }
  0x16   :  { %p414_p8 = scmp.ne.s32.totalorder %s600_s0, %s413_s21  ;;  %p417_p9 = scmp.lt.u32.totalorder %s413_s21, %s600_s0 }
  0x18   :  { %p419_p10 = pnand %p417_p9, %p414_p8 }
  0x1a   :  { %422 = shalt.err (!%p419_p10)
}
  0x1b   :  { %s423_s1 = scalar_lea.vmem %s23_s16, 128  ;;  %p428_p12 = scmp.lt.s32.totalorder %s23_s16, %s23_s16 }
  0x1c   :  { %p424_p11 = scmp.ne.s32.totalorder %s23_s16, %s423_s1  ;;  %p429_p13 = scmp.lt.s32.totalorder %s423_s1, %s423_s1 }
  0x1e   :  { %p430_p0 = por %p429_p13, %p428_p12 }
  0x20   :  { %p431_p1 = pnand %p430_p0, %p424_p11 }
  0x22   :  { %434 = shalt.err (!%p431_p1)
}
  0x23   :  { %25 = dma.hbm_to_vmem [thread:$0]  %s600_s0, 128, %s23_s16, [#allocation4]  }
  0x24   :  { %s435_s30 = scalar_lea.hbm %s603_s3, 2048 }
  0x25   :  { %p436_p2 = scmp.ne.s32.totalorder %s603_s3, %s435_s30  ;;  %p439_p3 = scmp.lt.u32.totalorder %s435_s30, %s603_s3 }
  0x27   :  { %p441_p4 = pnand %p439_p3, %p436_p2 }
  0x29   :  { %444 = shalt.err (!%p441_p4)
}
  0x2a   :  { %s445_s14 = scalar_lea.vmem %s46_s18, 2048  ;;  %p450_p6 = scmp.lt.s32.totalorder %s46_s18, %s46_s18 }
  0x2b   :  { %p446_p5 = scmp.ne.s32.totalorder %s46_s18, %s445_s14  ;;  %p451_p7 = scmp.lt.s32.totalorder %s445_s14, %s445_s14 }
  0x2d   :  { %p452_p8 = por %p451_p7, %p450_p6 }
  0x2f   :  { %p453_p9 = pnand %p452_p8, %p446_p5 }
  0x31   :  { %456 = shalt.err (!%p453_p9)
}
  0x32   :  { %51 = dma.hbm_to_vmem [thread:$0]  %s603_s3, 2048, %s46_s18, [#allocation7], %s486_s11, %s486_s11, %s487_s12  }
  0x33   :  { %479 = dma.done.wait [#allocation4], 128  }
  0x34   :  { %480 = vsyncadd [#allocation4], 4294967168 }
  0x35   :  { %481 = dma.done.wait [#allocation7], 2304  }
  0x36   :  { %482 = vsyncadd [#allocation7], 4294964992  ;;  %v490_v0 = vmov 0.0|0.0   ;;  %vm491_vm0 = vmmov 0   ;;  %v492_v1 = vmov 0.0   ;;  %v68_v2 = vld [vmem:[#allocation6] sm:$0xff]  ;;  %v260_v42 = vlaneseq }
  0x37   :  { %351 = vmatprep.subr.bf16.mxu0 %v490_v0  ;;  %313 = vmatprep.mubr.msk.f32.mxu0 %vm491_vm0, %v492_v1  ;;  %v69_v3 = vld [vmem:[#allocation6 + $0x8] sm:$0xff]  ;;  %v152_v5 = vld [vmem:[#allocation8] sm:$0xff]  ;;  %v153_v6 = vld [vmem:[#allocation8 + $0x8] sm:$0xff]  ;;  %vm77_vm1 = vcmask 130048   ;;  %v257_v45 = vstv %s606_s6  ;;  %vm267_vm2 = vcmask 57344  }
  0x38   :  { %354 = vmatprep.subr.bf16.mxu1 %v490_v0  ;;  %348 = vmatprep.mubr.msk.f32.mxu1 %vm491_vm0, %v492_v1  ;;  %v352_v4 = vpack.c.bf16 %v69_v3, %v68_v2  ;;  %v154_v7 = vld [vmem:[#allocation8 + $0x10] sm:$0xff]  ;;  %v355_v8 = vpack.c.bf16 %v153_v6, %v152_v5  ;;  %v155_v9 = vld [vmem:[#allocation8 + $0x18] sm:$0xff]  ;;  %v67_v10 = vld [vmem:[#allocation3] sm:$0xff]  ;;  %v261_v43 = vand.u32 127, %v260_v42  ;;  %v263_v44 = vshrl.u32 %v260_v42, 7 }
  0x39   :  { %v358_v11 = vpack.c.bf16 %v155_v9, %v154_v7  ;;  %v156_v12 = vld [vmem:[#allocation8 + $0x20] sm:$0xff]  ;;  %v157_v13 = vld [vmem:[#allocation8 + $0x28] sm:$0xff]  ;;  %v158_v15 = vld [vmem:[#allocation8 + $0x30] sm:$0xff] }
  0x3a   :  { %353 = vmatpush3.bf16.msra.mxu0 %v352_v4  ;;  %356 = vmatpush3.bf16.msra.mxu1 %v355_v8  ;;  %v361_v14 = vpack.c.bf16 %v157_v13, %v156_v12  ;;  %v159_v16 = vld [vmem:[#allocation8 + $0x38] sm:$0xff]  ;;  %v160_v18 = vld [vmem:[#allocation8 + $0x40] sm:$0xff]  ;;  %v161_v19 = vld [vmem:[#allocation8 + $0x48] sm:$0xff]  ;;  %v264_v46 = vsub.s32 %v261_v43, %v263_v44 }
  0x3b   :  { %357 = vmatprep.subr.bf16.mxu1 %v490_v0  ;;  %v364_v17 = vpack.c.bf16 %v159_v16, %v158_v15  ;;  %v367_v20 = vpack.c.bf16 %v161_v19, %v160_v18  ;;  %v162_v21 = vld [vmem:[#allocation8 + $0x50] sm:$0xff]  ;;  %v163_v22 = vld [vmem:[#allocation8 + $0x58] sm:$0xff]  ;;  %v164_v24 = vld [vmem:[#allocation8 + $0x60] sm:$0xff] }
  0x3c   :  { %v370_v23 = vpack.c.bf16 %v163_v22, %v162_v21  ;;  %v165_v25 = vld [vmem:[#allocation8 + $0x68] sm:$0xff]  ;;  %v166_v27 = vld [vmem:[#allocation8 + $0x70] sm:$0xff]  ;;  %v167_v28 = vld [vmem:[#allocation8 + $0x78] sm:$0xff] }
  0x3d   :  { %314 = vmatmul.mubr.msk.f32.vlgmr.msra.gmra.mrb[0].mxu0 %vm77_vm1, %v67_v10  ;;  %v373_v26 = vpack.c.bf16 %v165_v25, %v164_v24  ;;  %v376_v29 = vpack.c.bf16 %v167_v28, %v166_v27  ;;  %v285_v30 = vld [vmem:[%s602_s2] ss:$0 sm:$0xff] }
  0x3e   :  { %359 = vmatpush3.bf16.msra.mxu1 %v358_v11  ;;  %v287_v35 = vld [vmem:[%s604_s4] ss:$0 sm:$0xff]  ;;  %s493_s4 = smov [#allocation9]  }
  0x3f   :  { %360 = vmatprep.subr.bf16.mxu1 %v490_v0  ;;  %v288_v39 = vld [vmem:[%s605_s5] ss:$0 sm:$0xff]  ;;  %s275_s20 = sshll.u32 %s493_s4, 4  ;;  %s276_s20 = int_to_ptr.vmem [resolvable:$true] %s275_s20 }
  0x40   :  { %s457_s5 = scalar_lea.vmem %s276_s20, 16  ;;  %s461_s21 = scalar_lea.vmem %s276_s20, 32 }
  0x41   :  { %p458_p10 = scmp.ne.s32.totalorder %s276_s20, %s457_s5  ;;  %p462_p11 = scmp.lt.s32.totalorder %s276_s20, %s276_s20 }
  0x42   :  { %362 = vmatpush3.bf16.msra.mxu1 %v361_v14  ;;  %p463_p12 = scmp.lt.s32.totalorder %s461_s21, %s457_s5 }
  0x43   :  { %363 = vmatprep.subr.bf16.mxu1 %v490_v0 }
  0x44   :  { %p464_p13 = por %p463_p12, %p462_p11 }
  0x46   :  { %365 = vmatpush3.bf16.msra.mxu1 %v364_v17  ;;  %p465_p0 = pnand %p464_p13, %p458_p10 }
  0x47   :  { %366 = vmatprep.subr.bf16.mxu1 %v490_v0 }
  0x4a   :  { %368 = vmatpush3.bf16.msra.mxu1 %v367_v20 }
  0x4b   :  { %369 = vmatprep.subr.bf16.mxu1 %v490_v0 }
  0x4e   :  { %371 = vmatpush3.bf16.msra.mxu1 %v370_v23 }
  0x4f   :  { %372 = vmatprep.subr.bf16.mxu1 %v490_v0 }
  0x52   :  { %374 = vmatpush3.bf16.msra.mxu1 %v373_v26 }
  0x53   :  { %375 = vmatprep.subr.bf16.mxu1 %v490_v0 }
  0x56   :  { %377 = vmatpush3.bf16.msra.mxu1 %v376_v29 }
 0x110   :  { %v147_v31 = vpop.f32.mrb[0].mxu0 }
 0x111   :  { %v148_v32 = vadd.f32 %v285_v30, %v147_v31  ;;  %v315_v33 = vpop.f32.mrb[1].mxu0 }
 0x113   :  { %387 = vtanh.f32 %v148_v32 }
 0x11d   :  { %v388_v34 = vpop.eup %387 }
 0x11e   :  { %349 = vmatmul.mubr.f32.vlgmr.msra.gmra.mrb[0].mxu1 %v388_v34 }
 0x1f1   :  { %v241_v36 = vpop.f32.mrb[0].mxu1 }
 0x1f2   :  { %v242_v37 = vadd.f32 %v287_v35, %v241_v36  ;;  %v350_v38 = vpop.f32.mrb[1].mxu1 }
 0x1f4   :  { %389 = vtanh.f32 %v242_v37 }
 0x1fe   :  { %v390_v40 = vpop.eup %389 }
 0x1ff   :  { %v253_v41 = vmul.f32 %v390_v40, %v288_v39 }
 0x201   :  { %254 = vadd.xlane.f32.xlu0 %v253_v41 }
 0x28e   :  { %v255_v47 = vpop.xlane.xlu0 %254 }
 0x28f   :  { %v258_v48 = vadd.f32 %v257_v45, %v255_v47 }
 0x291   :  { %v265_v49 = vrot.slane %v258_v48, %v264_v46 }
 0x293   :  { %268 = vst.msk [vmem:[#allocation9] sm:$0x1] %vm267_vm2, %v265_v49 }
 0x294   :  { %468 = shalt.err (!%p465_p0)
}
 0x295   :  { %s469_s6 = scalar_lea.hbm %s607_s7, 16 }
 0x296   :  { %p470_p1 = scmp.ne.s32.totalorder %s607_s7, %s469_s6  ;;  %p473_p2 = scmp.lt.u32.totalorder %s469_s6, %s607_s7 }
 0x298   :  { %p475_p3 = pnand %p473_p2, %p470_p1 }
 0x29a   :  { %478 = shalt.err (!%p475_p3)
}
 0x29b   :  { %278 = dma.vmem_to_hbm [thread:$0]  %s276_s20, 16, %s607_s7, [#allocation5]  }
 0x29c   :  { %483 = dma.done.wait [#allocation5], 16  }
 0x29d   :  { %484 = vsyncadd [#allocation5], 4294967280 }
 0x29e   :  { %282 = vsyncpa [#allocation4], 1 }
 0x29f   :  { %283 = vsyncpa [#allocation7], 1 }
 0x2a0   :  { %284 = vsyncpa [#allocation5], 1 }

</bundles_post_ra>
